<compile_context>
chip_gen: v6e
topology: v6e:2x2x1
jax: 0.10.0
libtpu: 0.0.40
codegen_flags: <defaults>
</compile_context>

<pallas_src>
import jax
import jax.numpy as jnp
from jax.experimental import pallas as pl
from jax.experimental.pallas import tpu as pltpu


def _logreg_kernel(x_ref, w_ref, b_ref, p_ref):
    # x_ref: (TB, pack*F) VMEM (pipelined)   w_ref: (pack*F, pack) VMEM (resident)
    # b_ref: (1,) SMEM scalar                p_ref: (TB, pack) VMEM
    z = jnp.dot(x_ref[...], w_ref[...],
                preferred_element_type=jnp.float32) + b_ref[0]     # (TB, pack)
    p_ref[...] = jax.nn.sigmoid(z).astype(p_ref.dtype)             # EUP sigmoid


def logistic_regression_forward(x, weight, bias, *, tile_rows=4096):
    """x: (B, F), weight: (2, F), bias: (2,) -> (B, 2) softmax probabilities."""
    B, F = x.shape
    C = weight.shape[0]
    assert C == 2, "LogisticRegressionModel has exactly 2 output classes"

    # Fold the 2-class softmax into a single logit difference (once, outside
    # the kernel).
    w_diff = (weight[1] - weight[0]).astype(jnp.float32)           # (F,)
    b_diff = (bias[1] - bias[0]).astype(jnp.float32).reshape(1)    # (1,) -> SMEM

    # --- Lane packing: put `pack` original rows into one 128-lane packed row.
    pack = 1
    if F <= 128 and 128 % F == 0:
        pack = 128 // F                       # power of two
        while pack > 1 and B % pack != 0:     # batch must split evenly
            pack //= 2
    Bp, Fp = B // pack, F * pack
    x_pack = x.reshape(Bp, Fp)                # contiguous -> zero-copy reshape

    # Block-diagonal packed weight: w_pack[j*F:(j+1)*F, j] = w_diff, so
    # (x_pack @ w_pack)[r, j] = x[r*pack + j, :] @ w_diff.
    eye = jnp.eye(pack, dtype=jnp.float32)                          # (pack, pack)
    w_pack = (w_diff[None, :, None] * eye[:, None, :]).reshape(Fp, pack)

    # --- Batch tiling over packed rows: big tiles to amortize per-step
    # overhead, but keep >= 2 grid steps when the batch allows it (v7x megacore).
    rows8 = ((Bp + 7) // 8) * 8
    tb = max(8, min(tile_rows, rows8))
    if Bp >= 16 and pl.cdiv(Bp, tb) < 2:
        tb = ((pl.cdiv(Bp, 2) + 7) // 8) * 8
    grid = pl.cdiv(Bp, tb)                    # no jnp.pad: partial trailing block

    # VMEM budget: x tile tb*Fp*4 B + out tile tb*128(lane-padded)*4 B, each
    # double-buffered; tb=4096 packed rows -> ~8-9 MiB, safe on all generations.
    p = pl.pallas_call(
        _logreg_kernel,
        out_shape=jax.ShapeDtypeStruct((Bp, pack), jnp.float32),
        grid_spec=pltpu.PrefetchScalarGridSpec(
            num_scalar_prefetch=0,
            grid=(grid,),
            in_specs=[
                pl.BlockSpec((tb, Fp), lambda i: (i, 0)),           # x: tiled batch
                pl.BlockSpec((Fp, pack), lambda i: (0, 0)),         # weight: resident
                pl.BlockSpec(memory_space=pltpu.MemorySpace.SMEM),  # bias scalar
            ],
            out_specs=pl.BlockSpec((tb, pack), lambda i: (i, 0)),
        ),
        compiler_params=pltpu.CompilerParams(
            dimension_semantics=("parallel",),   # independent batch tiles
            vmem_limit_bytes=32 << 20,
        ),
        cost_estimate=pl.CostEstimate(
            flops=2 * B * F,
            transcendentals=B,
            bytes_accessed=B * F * x.dtype.itemsize + B * 4 + Fp * pack * 4,
        ),
    )(x_pack, w_pack, b_diff)

    p = p.reshape(B)                               # positive-class probability
    probs = jnp.stack([1.0 - p, p], axis=1)        # exact 2-class softmax
    return probs.astype(x.dtype)


if __name__ == "__main__":
    key = jax.random.PRNGKey(0)
    kx, kw, kb = jax.random.split(key, 3)

    feature_dim = 32
    num_classes = 2  # nn.Linear(feature_dim, 2)

    bound = 1.0 / (feature_dim ** 0.5)
    weight = jax.random.uniform(kw, (num_classes, feature_dim),
                                minval=-bound, maxval=bound, dtype=jnp.float32)
    bias = jax.random.uniform(kb, (num_classes,),
                              minval=-bound, maxval=bound, dtype=jnp.float32)

    def reference(xb):
        return jax.nn.softmax(xb @ weight.T + bias, axis=1)

    # Primary small shape (batch=8) plus two extra batch sizes that exercise
    # the multi-step grid / partial trailing block / unpacked fallback paths.
    for batch in (8, 100, 7):
        xb = jax.random.normal(jax.random.fold_in(kx, batch),
                               (batch, feature_dim), dtype=jnp.float32)
        out = jax.block_until_ready(
            logistic_regression_forward(xb, weight, bias))
        ref = reference(xb)
        assert out.shape == (batch, num_classes)
        assert jnp.allclose(out, ref, atol=1e-5, rtol=1e-5), f"mismatch at B={batch}"
        assert jnp.allclose(jnp.sum(out, axis=1), 1.0, atol=1e-5), f"sum!=1 at B={batch}"

    print("KERNEL_OK")
</pallas_src>

<mosaic_0001>
module attributes {stable_mosaic.version = 11 : i64} {
  func.func @_logreg_kernel(%arg0: i32, %arg1: memref<8x128xf32, #tpu.memory_space<vmem>>, %arg2: memref<128x4xf32, #tpu.memory_space<vmem>>, %arg3: memref<1xf32, #tpu.memory_space<smem>>, %arg4: memref<8x4xf32, #tpu.memory_space<vmem>>) attributes {dimension_semantics = [#tpu.dimension_semantics<parallel>], iteration_bounds = array<i64: 1>, scalar_prefetch = 0 : i64, scratch_operands = 0 : i64, tpu.core_type = #tpu.core_type<tc>, window_params = [{transform_indices = @transform_0, window_bounds = array<i64: 8, 128>}, {pipeline_mode = #tpu.pipeline_mode<synchronous>, transform_indices = @transform_1, window_bounds = array<i64: 128, 4>}, {transform_indices = @transform_2, window_bounds = array<i64: 1>}, {transform_indices = @transform_3, window_bounds = array<i64: 8, 4>}]} {
    %c0 = arith.constant 0 : index
    %c0_0 = arith.constant 0 : index
    %0 = vector.load %arg1[%c0, %c0_0] : memref<8x128xf32, #tpu.memory_space<vmem>>, vector<8x128xf32>
    %c0_1 = arith.constant 0 : index
    %c0_2 = arith.constant 0 : index
    %1 = vector.load %arg2[%c0_1, %c0_2] : memref<128x4xf32, #tpu.memory_space<vmem>>, vector<128x4xf32>
    %cst = arith.constant dense<0.000000e+00> : vector<8x4xf32>
    %2 = tpu.matmul %0, %1, %cst {dimension_numbers = #tpu.dot_dimension_numbers<[1], [0], [0], [1], [0, 0, 1, 1], [], []>} : vector<8x128xf32>, vector<128x4xf32>, vector<8x4xf32> -> vector<8x4xf32>
    %c0_3 = arith.constant 0 : index
    %3 = memref.load %arg3[%c0_3] : memref<1xf32, #tpu.memory_space<smem>>
    %4 = vector.broadcast %3 : f32 to vector<8x4xf32>
    %5 = arith.addf %2, %4 : vector<8x4xf32>
    %6 = arith.negf %5 : vector<8x4xf32>
    %7 = math.exp %6 : vector<8x4xf32>
    %cst_4 = arith.constant 1.000000e+00 : f32
    %8 = vector.broadcast %cst_4 : f32 to vector<8x4xf32>
    %9 = arith.addf %8, %7 : vector<8x4xf32>
    %10 = arith.divf %8, %9 : vector<8x4xf32>
    %c0_5 = arith.constant 0 : index
    %c0_6 = arith.constant 0 : index
    %11 = vector.load %arg4[%c0_5, %c0_6] : memref<8x4xf32, #tpu.memory_space<vmem>>, vector<8x4xf32>
    tpu.vector_store %arg4[%c0_5, %c0_6], %10 {strides = array<i32>} : memref<8x4xf32, #tpu.memory_space<vmem>>, vector<8x4xf32>,
    return
  }
  func.func @transform_0(%arg0: i32) -> (i32, i32) {
    %c0_i32 = arith.constant 0 : i32
    %c0_i32_0 = arith.constant 0 : i32
    return %arg0, %c0_i32 : i32, i32
  }
  func.func @transform_1(%arg0: i32) -> (i32, i32) {
    %c0_i32 = arith.constant 0 : i32
    %c0_i32_0 = arith.constant 0 : i32
    %c0_i32_1 = arith.constant 0 : i32
    return %c0_i32, %c0_i32_0 : i32, i32
  }
  func.func @transform_2(%arg0: i32) -> i32 {
    %c0_i32 = arith.constant 0 : i32
    %c0_i32_0 = arith.constant 0 : i32
    return %c0_i32 : i32
  }
  func.func @transform_3(%arg0: i32) -> (i32, i32) {
    %c0_i32 = arith.constant 0 : i32
    %c0_i32_0 = arith.constant 0 : i32
    return %arg0, %c0_i32 : i32, i32
  }
}

</mosaic_0001>

<bundles_post_ra>
// kernel: tpu_custom_call.1
= control target key start
LH: loop header
LB: loop body
LE: loop exit
PB: predicated region body
PF: predicated region fallthrough
CT: control target
= control target key end

     0   :  { %9 = vsyncpa [#allocation4], 0  ;;  %v213_v1 = vmov 0.0   ;;  %vm214_vm0 = vmmov 0   ;;  %vm111_vm1 = vcmask 31744   ;;  %s295_s0 = inlined_call_operand.vmem [shape: f32[2,128], index: 0, kind: input, shape index: {}]   ;;  %s296_s1 = inlined_call_operand.vmem [shape: f32[128,4], index: 1, kind: input, shape index: {}]   ;;  %s297_s2 = inlined_call_operand.<no memory space> [shape: f32[1], index: 2, kind: input, shape index: {}]   ;;  %s298_s3 = inlined_call_operand.hbm [shape: f32[2,4], index: 3, kind: output, shape index: {}]  }
   0x1   :  { %v32_v0 = vld [vmem:[%s296_s1 + $0x78] sm:$0xff]  ;;  %147 = vmatprep.subr.mxu0 %v213_v1  ;;  %v31_v2 = vld [vmem:[%s296_s1 + $0x70] sm:$0xff]  ;;  %179 = vmatprep.mubr.msk.f32.mxu0 %vm214_vm0, %v213_v1  ;;  %v30_v3 = vld [vmem:[%s296_s1 + $0x68] sm:$0xff]  ;;  %v34_v18 = vstv %s297_s2 }
   0x2   :  { %148 = vmatpush3.msra.mxu0 %v32_v0  ;;  %v29_v4 = vld [vmem:[%s296_s1 + $0x60] sm:$0xff]  ;;  %v28_v5 = vld [vmem:[%s296_s1 + $0x58] sm:$0xff]  ;;  %v27_v6 = vld [vmem:[%s296_s1 + $0x50] sm:$0xff] }
   0x3   :  { %149 = vmatprep.subr.mxu0 %v213_v1  ;;  %v26_v7 = vld [vmem:[%s296_s1 + $0x48] sm:$0xff]  ;;  %v25_v8 = vld [vmem:[%s296_s1 + $0x40] sm:$0xff]  ;;  %v24_v9 = vld [vmem:[%s296_s1 + $0x38] sm:$0xff] }
   0x4   :  { %150 = vmatpush3.msra.mxu0 %v31_v2  ;;  %v23_v10 = vld [vmem:[%s296_s1 + $0x30] sm:$0xff]  ;;  %v22_v11 = vld [vmem:[%s296_s1 + $0x28] sm:$0xff]  ;;  %v21_v12 = vld [vmem:[%s296_s1 + $0x20] sm:$0xff] }
   0x5   :  { %151 = vmatprep.subr.mxu0 %v213_v1  ;;  %v20_v13 = vld [vmem:[%s296_s1 + $0x18] sm:$0xff]  ;;  %v19_v14 = vld [vmem:[%s296_s1 + $0x10] sm:$0xff]  ;;  %v18_v15 = vld [vmem:[%s296_s1 + $0x8] sm:$0xff] }
   0x6   :  { %152 = vmatpush3.msra.mxu0 %v30_v3  ;;  %v17_v16 = vld [vmem:[%s296_s1] sm:$0xff] }
   0x7   :  { %153 = vmatprep.subr.mxu0 %v213_v1  ;;  %v16_v17 = vld [vmem:[%s295_s0] sm:$0xff] }
   0x8   :  { %154 = vmatpush3.msra.mxu0 %v29_v4 }
   0x9   :  { %155 = vmatprep.subr.mxu0 %v213_v1 }
   0xa   :  { %156 = vmatpush3.msra.mxu0 %v28_v5 }
   0xb   :  { %157 = vmatprep.subr.mxu0 %v213_v1 }
   0xc   :  { %158 = vmatpush3.msra.mxu0 %v27_v6 }
   0xd   :  { %159 = vmatprep.subr.mxu0 %v213_v1 }
   0xe   :  { %160 = vmatpush3.msra.mxu0 %v26_v7 }
   0xf   :  { %161 = vmatprep.subr.mxu0 %v213_v1 }
  0x10   :  { %162 = vmatpush3.msra.mxu0 %v25_v8 }
  0x11   :  { %163 = vmatprep.subr.mxu0 %v213_v1 }
  0x12   :  { %164 = vmatpush3.msra.mxu0 %v24_v9 }
  0x13   :  { %165 = vmatprep.subr.mxu0 %v213_v1 }
  0x14   :  { %166 = vmatpush3.msra.mxu0 %v23_v10 }
  0x15   :  { %167 = vmatprep.subr.mxu0 %v213_v1 }
  0x16   :  { %168 = vmatpush3.msra.mxu0 %v22_v11 }
  0x17   :  { %169 = vmatprep.subr.mxu0 %v213_v1 }
  0x18   :  { %170 = vmatpush3.msra.mxu0 %v21_v12 }
  0x19   :  { %171 = vmatprep.subr.mxu0 %v213_v1 }
  0x1a   :  { %172 = vmatpush3.msra.mxu0 %v20_v13 }
  0x1b   :  { %173 = vmatprep.subr.mxu0 %v213_v1 }
  0x1c   :  { %174 = vmatpush3.msra.mxu0 %v19_v14 }
  0x1d   :  { %175 = vmatprep.subr.mxu0 %v213_v1 }
  0x1e   :  { %176 = vmatpush3.msra.mxu0 %v18_v15 }
  0x1f   :  { %177 = vmatprep.subr.mxu0 %v213_v1 }
  0x20   :  { %178 = vmatpush3.msra.mxu0 %v17_v16 }
  0x21   :  { %180 = vmatmul.mubr.f32.vlgmr.msra.gmra.mxu0 %v16_v17 }
  0xe1   :  { %v101_v19 = vpop.f32.mrf.mxu0 }
  0xe2   :  { %v102_v20 = vadd.f32 %v101_v19, %v34_v18 }
  0xe3   :  { %v181_v21 = vpop.f32.mrf.mxu0 }
  0xe4   :  { %v129_v22 = vmul.f32 -1.442695, %v102_v20 }
  0xe6   :  { %187 = vpow2.f32 %v129_v22 }
  0xf3   :  { %v188_v23 = vpop.eup %187 }
  0xf4   :  { %v108_v24 = vadd.f32 1.0, %v188_v23 }
  0xf6   :  { %189 = vrcp.f32 %v108_v24 }
 0x103   :  { %v190_v25 = vpop.eup %189 }
 0x104   :  { %112 = vst.msk [vmem:[#allocation3] sm:$0xff] %vm111_vm1, %v190_v25 }
 0x105   :  { %117 = vsyncadd [#allocation4], 96  ;;  %s215_s0 = smov [#allocation3]  }
 0x106   :  { %s118_s1 = sshll.u32 %s215_s0, 4  ;;  %s119_s1 = int_to_ptr.vmem [resolvable:$true] %s118_s1 }
 0x107   :  { %s191_s21 = scalar_lea.vmem %s119_s1, 32  ;;  %s195_s22 = scalar_lea.vmem %s119_s1, 128 }
 0x108   :  { %p192_p0 = scmp.ne.s32.totalorder %s119_s1, %s191_s21  ;;  %p196_p1 = scmp.lt.s32.totalorder %s119_s1, %s119_s1 }
 0x109   :  { %p197_p2 = scmp.lt.s32.totalorder %s195_s22, %s191_s21 }
 0x10b   :  { %p198_p3 = por %p197_p2, %p196_p1 }
 0x10d   :  { %p199_p4 = pnand %p198_p3, %p192_p0 }
 0x10f   :  { %202 = shalt.err (!%p199_p4)
}
 0x110   :  { %s216_s2 = smov 32   ;;  %s217_s23 = smov 2  }
 0x111   :  { %124 = dma.vmem_to_hbm [thread:$0]  %s119_s1, 32, %s298_s3, [#allocation4], %s216_s2, %s216_s2, %s217_s23  }
 0x112   :  { %211 = dma.done.wait [#allocation4], 128  }
 0x113   :  { %212 = vsyncadd [#allocation4], 4294967168 }
 0x114   :  { %128 = vsyncpa [#allocation4], 1 }

</bundles_post_ra>
